<compile_context>
chip_gen: v6e
topology: v6e:2x2x1
jax: 0.10.0
libtpu: 0.0.40
codegen_flags: <defaults>
</compile_context>

<pallas_src>
import functools

import jax
import jax.numpy as jnp
from jax.experimental import pallas as pl
from jax.experimental.pallas import tpu as pltpu


def fuse_to_lstm_hidden_state_params(w_f, b_f, w_b, b_b):
    """One-time parameter prep: fuse the two projections into a single matmul.

    Call ONCE when parameters are created/loaded (outside the jitted forward),
    so the concatenation is not a per-call HBM round trip.
    """
    w = jnp.concatenate([w_f, w_b], axis=1)   # (d_in, 2*L*H)
    b = jnp.concatenate([b_f, b_b], axis=1)   # (1,    2*L*H)
    return w, b


def _fused_proj_kernel(x_ref, w_ref, b_ref, out_ref):
    # One lane-dense MXU matmul over the fused [W_f | W_b] weight, one
    # broadcast bias add (VPU), one unmasked full-tile store.
    y = jnp.dot(x_ref[...], w_ref[...], preferred_element_type=jnp.float32)
    out_ref[...] = (y + b_ref[...]).astype(out_ref.dtype)


def _fused_proj_to_layers_kernel(x_ref, w_ref, b_ref, out_ref):
    # Same matmul, but the (2L, tb, H) layout is emitted directly: every chunk
    # y[:, c*H:(c+1)*H] is a lane-tile-aligned static slice (H % 128 == 0 is
    # guaranteed by the caller), so all 2L stores are unmasked (tb, H) tiles.
    h = out_ref.shape[2]
    y = jnp.dot(x_ref[...], w_ref[...], preferred_element_type=jnp.float32)
    y = (y + b_ref[...]).astype(out_ref.dtype)
    for c in range(out_ref.shape[0]):          # static unroll over 2*num_layers
        out_ref[c, :, :] = y[:, c * h:(c + 1) * h]


@functools.partial(jax.jit, static_argnames=("num_layers", "hidden_size"))
def to_lstm_hidden_state(x, w_fused, b_fused, *, num_layers, hidden_size):
    """x: (B, d_in); w_fused: (d_in, 2*L*H); b_fused: (1, 2*L*H).

    Returns (2*L, B, H), matching the PyTorch module's forward.
    """
    B, d_in = x.shape
    out2 = 2 * num_layers * hidden_size
    assert w_fused.shape == (d_in, out2), w_fused.shape
    assert b_fused.shape == (1, out2), b_fused.shape

    # Batch tile: multiple of 8 (f32 sublane packing), capped at 256. When
    # B >= 16, pick tb so there are >= 2 grid steps so the "parallel" batch
    # axis can shard across v7x's two TensorCores.
    if B >= 16:
        tb = min(256, ((-(-B // 2) + 7) // 8) * 8)
    else:
        tb = ((B + 7) // 8) * 8
    nb = pl.cdiv(B, tb)   # partial last block handled by Pallas (no pad/slice)

    itemsize = jnp.dtype(x.dtype).itemsize
    cost = pl.CostEstimate(
        flops=2 * B * d_in * out2,
        transcendentals=0,
        bytes_accessed=(B * d_in + d_in * out2 + out2 + B * out2) * itemsize,
    )

    # VMEM budget: x/out tiles double-buffered, fused weight & bias single-
    # buffered (grid-invariant blocks). Explicit limit with 2x headroom.
    vmem_bytes = (2 * tb * d_in + d_in * out2 + out2 + 2 * tb * out2) * itemsize
    vmem_limit = int(min(max(2 * vmem_bytes, 4 << 20), 64 << 20))
    params = pltpu.CompilerParams(
        dimension_semantics=("parallel",),
        vmem_limit_bytes=vmem_limit,
    )

    # TODO(synk): if d_in or 2*L*H scale into the tens of MiB (v7x: 64 MiB VMEM),
    # add an N-axis ("parallel") and/or K-axis ("arbitrary" + f32 acc scratch)
    # grid dimension over the weight instead of one full-width weight block.
    x_spec = pl.BlockSpec((tb, d_in), lambda i: (i, 0))
    w_spec = pl.BlockSpec((d_in, out2), lambda i: (0, 0),
                          pipeline_mode=pl.Buffered(1))      # grid-invariant block
    b_spec = pl.BlockSpec((1, out2), lambda i: (0, 0),
                          pipeline_mode=pl.Buffered(1))

    if hidden_size % 128 == 0:
        # Emit (2L, B, H) directly from the kernel; the wrapper transpose (a
        # second HBM pass over the output) disappears.
        return pl.pallas_call(
            _fused_proj_to_layers_kernel,
            out_shape=jax.ShapeDtypeStruct((2 * num_layers, B, hidden_size), x.dtype),
            grid=(nb,),
            in_specs=[x_spec, w_spec, b_spec],
            out_specs=pl.BlockSpec((2 * num_layers, tb, hidden_size),
                                   lambda i: (0, i, 0)),
            compiler_params=params,
            cost_estimate=cost,
        )(x, w_fused, b_fused)

    # H < 128: keep a single lane-dense (tb, 2*L*H) unmasked store; the
    # chunk/cat reshuffle is a cheap reshape+transpose left to XLA.
    y = pl.pallas_call(
        _fused_proj_kernel,
        out_shape=jax.ShapeDtypeStruct((B, out2), x.dtype),
        grid=(nb,),
        in_specs=[x_spec, w_spec, b_spec],
        out_specs=pl.BlockSpec((tb, out2), lambda i: (i, 0)),
        compiler_params=params,
        cost_estimate=cost,
    )(x, w_fused, b_fused)
    # (B, 2L, H) -> (2L, B, H): layer l lives at out[l] (forward) and out[L+l]
    # (backward), exactly matching torch's unsqueeze(0).chunk(L, -1) + cat.
    return jnp.transpose(y.reshape(B, 2 * num_layers, hidden_size), (1, 0, 2))


def _reference(x, w_f, b_f, w_b, b_b, num_layers, hidden_size):
    """Pure-JAX mirror of the PyTorch forward, for correctness checking."""
    B = x.shape[0]
    f = x @ w_f + b_f                                   # (B, H*L)
    b = x @ w_b + b_b
    f = jnp.transpose(f.reshape(B, num_layers, hidden_size), (1, 0, 2))  # (L, B, H)
    b = jnp.transpose(b.reshape(B, num_layers, hidden_size), (1, 0, 2))
    return jnp.concatenate([f, b], axis=0)              # (2L, B, H)


def _run_case(key, *, batch, input_size, hidden_size, num_layers):
    out_dim = hidden_size * num_layers
    k_x, k_wf, k_bf, k_wb, k_bb = jax.random.split(key, 5)
    bound = 1.0 / (input_size ** 0.5)
    x = jax.random.normal(k_x, (batch, input_size), dtype=jnp.float32)
    # PyTorch Linear stores (out, in); we keep the transposed (in, out) layout
    # so the kernel computes x @ W + bias directly.
    w_f = jax.random.uniform(k_wf, (input_size, out_dim), jnp.float32, -bound, bound)
    b_f = jax.random.uniform(k_bf, (1, out_dim), jnp.float32, -bound, bound)
    w_b = jax.random.uniform(k_wb, (input_size, out_dim), jnp.float32, -bound, bound)
    b_b = jax.random.uniform(k_bb, (1, out_dim), jnp.float32, -bound, bound)

    # One-time parameter prep (outside the jitted forward / hot loop).
    w_fused, b_fused = jax.block_until_ready(
        fuse_to_lstm_hidden_state_params(w_f, b_f, w_b, b_b))

    out = to_lstm_hidden_state(x, w_fused, b_fused,
                               num_layers=num_layers, hidden_size=hidden_size)
    out = jax.block_until_ready(out)

    ref = _reference(x, w_f, b_f, w_b, b_b, num_layers, hidden_size)
    assert out.shape == (2 * num_layers, batch, hidden_size), out.shape
    assert jnp.allclose(out, ref, atol=1e-5, rtol=1e-5), "mismatch vs reference"


if __name__ == "__main__":
    k1, k2 = jax.random.split(jax.random.PRNGKey(0))
    # Config implied by nn.LSTM(input_size=32, hidden_size=32, num_layers=2):
    # H < 128 path (lane-dense 2-D output + wrapper transpose), single grid step.
    _run_case(k1, batch=8, input_size=32, hidden_size=32, num_layers=2)
    # H % 128 == 0 path: direct (2L, B, H) layout from the kernel, 2-step batch
    # grid with a partial last block (exercises the no-pad path and lets the
    # "parallel" axis split across v7x's 2 TensorCores).
    _run_case(k2, batch=24, input_size=64, hidden_size=128, num_layers=2)
    print("KERNEL_OK")
</pallas_src>

<mosaic_0001>
module attributes {stable_mosaic.version = 11 : i64} {
  func.func @_fused_proj_kernel(%arg0: i32, %arg1: memref<8x32xf32, #tpu.memory_space<vmem>>, %arg2: memref<32x128xf32, #tpu.memory_space<vmem>>, %arg3: memref<1x128xf32, #tpu.memory_space<vmem>>, %arg4: memref<8x128xf32, #tpu.memory_space<vmem>>) attributes {dimension_semantics = [#tpu.dimension_semantics<parallel>], iteration_bounds = array<i64: 1>, scalar_prefetch = 0 : i64, scratch_operands = 0 : i64, tpu.core_type = #tpu.core_type<tc>, window_params = [{transform_indices = @transform_0, window_bounds = array<i64: 8, 32>}, {pipeline_mode = #tpu.pipeline_mode<synchronous>, transform_indices = @transform_1, window_bounds = array<i64: 32, 128>}, {pipeline_mode = #tpu.pipeline_mode<synchronous>, transform_indices = @transform_2, window_bounds = array<i64: 1, 128>}, {transform_indices = @transform_3, window_bounds = array<i64: 8, 128>}]} {
    %c0 = arith.constant 0 : index
    %c0_0 = arith.constant 0 : index
    %0 = vector.load %arg1[%c0, %c0_0] : memref<8x32xf32, #tpu.memory_space<vmem>>, vector<8x32xf32>
    %c0_1 = arith.constant 0 : index
    %c0_2 = arith.constant 0 : index
    %1 = vector.load %arg2[%c0_1, %c0_2] : memref<32x128xf32, #tpu.memory_space<vmem>>, vector<32x128xf32>
    %cst = arith.constant dense<0.000000e+00> : vector<8x128xf32>
    %2 = tpu.matmul %0, %1, %cst {dimension_numbers = #tpu.dot_dimension_numbers<[1], [0], [0], [1], [0, 0, 1, 1], [], []>} : vector<8x32xf32>, vector<32x128xf32>, vector<8x128xf32> -> vector<8x128xf32>
    %c0_3 = arith.constant 0 : index
    %c0_4 = arith.constant 0 : index
    %3 = vector.load %arg3[%c0_3, %c0_4] : memref<1x128xf32, #tpu.memory_space<vmem>>, vector<1x128xf32>
    %4 = vector.broadcast %3 : vector<1x128xf32> to vector<8x128xf32>
    %5 = arith.addf %2, %4 : vector<8x128xf32>
    %c0_5 = arith.constant 0 : index
    %c0_6 = arith.constant 0 : index
    %6 = vector.load %arg4[%c0_5, %c0_6] : memref<8x128xf32, #tpu.memory_space<vmem>>, vector<8x128xf32>
    tpu.vector_store %arg4[%c0_5, %c0_6], %5 {strides = array<i32>} : memref<8x128xf32, #tpu.memory_space<vmem>>, vector<8x128xf32>,
    return
  }
  func.func @transform_0(%arg0: i32) -> (i32, i32) {
    %c0_i32 = arith.constant 0 : i32
    %c0_i32_0 = arith.constant 0 : i32
    return %arg0, %c0_i32 : i32, i32
  }
  func.func @transform_1(%arg0: i32) -> (i32, i32) {
    %c0_i32 = arith.constant 0 : i32
    %c0_i32_0 = arith.constant 0 : i32
    %c0_i32_1 = arith.constant 0 : i32
    return %c0_i32, %c0_i32_0 : i32, i32
  }
  func.func @transform_2(%arg0: i32) -> (i32, i32) {
    %c0_i32 = arith.constant 0 : i32
    %c0_i32_0 = arith.constant 0 : i32
    %c0_i32_1 = arith.constant 0 : i32
    return %c0_i32, %c0_i32_0 : i32, i32
  }
  func.func @transform_3(%arg0: i32) -> (i32, i32) {
    %c0_i32 = arith.constant 0 : i32
    %c0_i32_0 = arith.constant 0 : i32
    return %arg0, %c0_i32 : i32, i32
  }
}

</mosaic_0001>

<bundles_post_ra>
// kernel: to_lstm_hidden_state.1
= control target key start
LH: loop header
LB: loop body
LE: loop exit
PB: predicated region body
PF: predicated region fallthrough
CT: control target
= control target key end

     0   :  { %8 = vsyncpa [#allocation3], 0  ;;  %s239_s0 = inlined_call_operand.hbm [shape: f32[8,32], index: 0, kind: input, shape index: {}]   ;;  %s240_s1 = inlined_call_operand.hbm [shape: f32[32,128], index: 1, kind: input, shape index: {}]   ;;  %s241_s2 = inlined_call_operand.vmem [shape: f32[1,128], index: 2, kind: input, shape index: {}]   ;;  %s242_s3 = inlined_call_operand.vmem [shape: f32[8,128], index: 3, kind: output, shape index: {}]  }
   0x1   :  { %9 = vsyncpa [#allocation5], 0  ;;  %s201_s12 = smov [#allocation2]   ;;  %s202_s14 = smov [#allocation4]  }
   0x2   :  { %s16_s13 = sshll.u32 %s201_s12, 4  ;;  %s25_s15 = sshll.u32 %s202_s14, 4  ;;  %s17_s13 = int_to_ptr.vmem [resolvable:$true] %s16_s13  ;;  %s26_s15 = int_to_ptr.vmem [resolvable:$true] %s25_s15 }
   0x3   :  { %s165_s16 = scalar_lea.vmem %s17_s13, 128  ;;  %p170_p1 = scmp.lt.s32.totalorder %s17_s13, %s17_s13 }
   0x4   :  { %p166_p0 = scmp.ne.s32.totalorder %s17_s13, %s165_s16  ;;  %p171_p2 = scmp.lt.s32.totalorder %s165_s16, %s165_s16 }
   0x6   :  { %p172_p3 = por %p171_p2, %p170_p1 }
   0x8   :  { %p173_p4 = pnand %p172_p3, %p166_p0 }
   0xa   :  { %176 = shalt.err (!%p173_p4)
}
   0xb   :  { %19 = dma.hbm_to_vmem [thread:$0]  %s239_s0, 128, %s17_s13, [#allocation3]  }
   0xc   :  { %s185_s19 = scalar_lea.vmem %s26_s15, 512  ;;  %p190_p6 = scmp.lt.s32.totalorder %s26_s15, %s26_s15 }
   0xd   :  { %p186_p5 = scmp.ne.s32.totalorder %s26_s15, %s185_s19  ;;  %p191_p7 = scmp.lt.s32.totalorder %s185_s19, %s185_s19 }
   0xf   :  { %p192_p8 = por %p191_p7, %p190_p6 }
  0x11   :  { %p193_p9 = pnand %p192_p8, %p186_p5 }
  0x13   :  { %196 = shalt.err (!%p193_p9)
}
  0x14   :  { %s203_s20 = smov 128   ;;  %s204_s21 = smov 8  }
  0x15   :  { %31 = dma.hbm_to_vmem [thread:$0]  %s240_s1, 512, %s26_s15, [#allocation5], %s203_s20, %s203_s20, %s204_s21  }
  0x16   :  { %197 = dma.done.wait [#allocation3], 128  }
  0x17   :  { %198 = vsyncadd [#allocation3], 4294967168 }
  0x18   :  { %199 = dma.done.wait [#allocation5], 512  }
  0x19   :  { %200 = vsyncadd [#allocation5], 4294966784  ;;  %v205_v0 = vmov 0.0   ;;  %vm206_vm0 = vmmov 0   ;;  %v44_v1 = vld [vmem:[#allocation4 + $0x18] sm:$0xff]  ;;  %v43_v2 = vld [vmem:[#allocation4 + $0x10] sm:$0xff] }
  0x1a   :  { %140 = vmatprep.subr.mxu0 %v205_v0  ;;  %148 = vmatprep.mubr.msk.f32.mxu0 %vm206_vm0, %v205_v0  ;;  %v42_v3 = vld [vmem:[#allocation4 + $0x8] sm:$0xff]  ;;  %v41_v4 = vld [vmem:[#allocation4] sm:$0xff]  ;;  %v40_v5 = vld [vmem:[#allocation2] sm:$0xff]  ;;  %vm52_vm1 = vcmask 261120  }
  0x1b   :  { %141 = vmatpush3.msra.mxu0 %v44_v1  ;;  %v133_v6 = vld [vmem:[%s241_s2] ss:$0 sm:$0xff] }
  0x1c   :  { %142 = vmatprep.subr.mxu0 %v205_v0 }
  0x1d   :  { %143 = vmatpush3.msra.mxu0 %v43_v2 }
  0x1e   :  { %144 = vmatprep.subr.mxu0 %v205_v0 }
  0x1f   :  { %145 = vmatpush3.msra.mxu0 %v42_v3 }
  0x20   :  { %146 = vmatprep.subr.mxu0 %v205_v0 }
  0x21   :  { %147 = vmatpush3.msra.mxu0 %v41_v4 }
  0x22   :  { %149 = vmatmul.mubr.msk.f32.vlgmr.msra.gmra.mxu0 %vm52_vm1, %v40_v5 }
  0xe2   :  { %v122_v7 = vpop.f32.mrf.mxu0 }
  0xe3   :  { %v123_v8 = vadd.f32 %v133_v6, %v122_v7 }
  0xe4   :  { %v150_v9 = vpop.f32.mrf.mxu0 }
  0xe5   :  { %126 = vst [vmem:[%s242_s3] sm:$0xff] %v123_v8 }
  0xe6   :  { %131 = vsyncpa [#allocation3], 1 }
  0xe7   :  { %132 = vsyncpa [#allocation5], 1 }

</bundles_post_ra>
